<compile_context>
chip_gen: v7x
topology: tpu7x:2x2x1
jax: 0.10.0
libtpu: 0.0.40
codegen_flags: <defaults>
</compile_context>

<pallas_src>
import jax
import jax.numpy as jnp
from jax.experimental import pallas as pl
from jax.experimental.pallas import tpu as pltpu


def _round_up(a, m):
    return ((a + m - 1) // m) * m


def forestdnn_kernel(x_ref,
                     w1_ref, b1_ref,
                     w2_ref, b2_ref,
                     w3_ref, b3_ref,
                     w4t_ref, b4t_ref,
                     ot_ref):
    """Fused 4-layer MLP: (Linear + ReLU) x3 -> Linear, logits emitted transposed.

    Matmul inputs are bf16 (MXU fast path); accumulation and all elementwise
    work (bias add, ReLU) stay f32.  Final layer: out^T = w4^T @ h3^T so the
    store is a small lane-dense (n_cls_pad, tb) block.
    """
    x = x_ref[...]                                                    # (tb, F) bf16

    h = jnp.dot(x, w1_ref[...], preferred_element_type=jnp.float32) + b1_ref[...]
    h = jnp.maximum(h, 0.0)                                           # dropout = identity (eval)

    h = jnp.dot(h.astype(jnp.bfloat16), w2_ref[...],
                preferred_element_type=jnp.float32) + b2_ref[...]
    h = jnp.maximum(h, 0.0)

    h = jnp.dot(h.astype(jnp.bfloat16), w3_ref[...],
                preferred_element_type=jnp.float32) + b3_ref[...]
    h = jnp.maximum(h, 0.0)                                           # (tb, h3) f32

    h3t = jnp.transpose(h).astype(jnp.bfloat16)                       # (h3, tb), XLU slot
    out_t = jnp.dot(w4t_ref[...], h3t,
                    preferred_element_type=jnp.float32) + b4t_ref[...]
    ot_ref[...] = out_t.astype(ot_ref.dtype)                          # lane-dense (n_cls_pad, tb)


def _choose_tile(B, batch_tile):
    """Pick (rows-per-step tb, padded batch B_pad).

    tb is a multiple of 128 whenever the grid has more than one step (keeps the
    transposed output blocks lane-dense); B_pad is a multiple of tb.
    """
    B8 = _round_up(B, 8)
    if B8 <= 128:
        return B8, B8                       # one block == full (tiny) array
    B128 = _round_up(B, 128)
    target = max(128, _round_up(batch_tile, 128))
    nsteps = pl.cdiv(B128, target)
    if nsteps == 1 and B128 >= 2048:
        nsteps = 2                          # >=2 grid steps so v7x's 2 TCs both get work
    tb = _round_up(pl.cdiv(B128, nsteps), 128)
    return tb, nsteps * tb


def forestdnn_forward(x, params, *, batch_tile=4096):
    """Run the fused ForestDNN forward pass.

    Args:
      x: [B, F] input (any float dtype; cast to bf16 for the MXU).
      params: dict with w1..w4 stored as (in, out) and b1..b4 as (1, out), f32.
      batch_tile: target rows per grid step (default 4096).

    Returns:
      [B, n_classes] float32 logits.
    """
    B, F = x.shape
    n_classes = params["w4"].shape[1]
    ncls_pad = _round_up(n_classes, 8)      # sublane-pad the transposed logit rows

    tb, B_pad = _choose_tile(B, batch_tile)
    grid = (B_pad // tb,)

    # ---- operand prep: bf16 matmul inputs, f32 biases, transposed last layer ----
    x_p = x.astype(jnp.bfloat16)
    if B_pad != B:
        x_p = jnp.pad(x_p, ((0, B_pad - B), (0, 0)))

    w1 = params["w1"].astype(jnp.bfloat16)
    w2 = params["w2"].astype(jnp.bfloat16)
    w3 = params["w3"].astype(jnp.bfloat16)
    w4t = jnp.pad(params["w4"].T,
                  ((0, ncls_pad - n_classes), (0, 0))).astype(jnp.bfloat16)   # (ncls_pad, h3)
    b1 = params["b1"].astype(jnp.float32)
    b2 = params["b2"].astype(jnp.float32)
    b3 = params["b3"].astype(jnp.float32)
    b4t = jnp.pad(params["b4"].astype(jnp.float32).T,
                  ((0, ncls_pad - n_classes), (0, 0)))                        # (ncls_pad, 1)

    h1, h2, h3 = w1.shape[1], w2.shape[1], w3.shape[1]

    def full(arr):
        # Whole (small, <250 KB total) weight/bias resident in VMEM every step.
        # TODO(synk): pipeline_mode=pl.Buffered(1) would drop the redundant
        #             double buffers for these constant-index blocks (~230 KB
        #             VMEM); left off pending confirmation single-buffering is
        #             accepted by this Mosaic version (compile safety first).
        return pl.BlockSpec(arr.shape, lambda i: (0,) * arr.ndim)

    weight_bytes = sum(int(a.size) * a.dtype.itemsize
                       for a in (w1, b1, w2, b2, w3, b3, w4t, b4t))
    cost = pl.CostEstimate(
        flops=2 * B_pad * (F * h1 + h1 * h2 + h2 * h3 + h3 * ncls_pad),
        transcendentals=0,
        bytes_accessed=B_pad * F * 2 + ncls_pad * B_pad * 4 + weight_bytes,
    )

    out_t = pl.pallas_call(
        forestdnn_kernel,
        out_shape=jax.ShapeDtypeStruct((ncls_pad, B_pad), jnp.float32),
        grid_spec=pltpu.PrefetchScalarGridSpec(
            num_scalar_prefetch=0,
            grid=grid,
            in_specs=[
                pl.BlockSpec((tb, F), lambda i: (i, 0)),
                full(w1), full(b1),
                full(w2), full(b2),
                full(w3), full(b3),
                full(w4t), full(b4t),
            ],
            out_specs=pl.BlockSpec((ncls_pad, tb), lambda i: (0, i)),
        ),
        compiler_params=pltpu.CompilerParams(
            dimension_semantics=("parallel",),
            vmem_limit_bytes=48 * 1024 * 1024,   # > v5e's 16 MiB default, < v7x's 64 MiB physical
        ),
        cost_estimate=cost,
    )(x_p, w1, b1, w2, b2, w3, b3, w4t, b4t)

    # Tiny (ncls_pad, B_pad) slab -> (B, n_classes); negligible HBM traffic
    # compared with re-reading the old (B_pad, 128) f32 output.
    return out_t[:n_classes, :B].T


def init_params(key, input_features, n_hidden_1=256, n_hidden_2=128,
                n_hidden_3=64, n_classes=2):
    """Deterministic init mirroring nn.Linear's U(-1/sqrt(fan_in), 1/sqrt(fan_in)).

    Weights are stored as (in, out) — transposed relative to PyTorch.
    """
    dims = [(input_features, n_hidden_1),
            (n_hidden_1, n_hidden_2),
            (n_hidden_2, n_hidden_3),
            (n_hidden_3, n_classes)]
    params = {}
    for idx, (fan_in, fan_out) in enumerate(dims, start=1):
        key, kw, kb = jax.random.split(key, 3)
        bound = 1.0 / jnp.sqrt(jnp.float32(fan_in))
        params[f"w{idx}"] = jax.random.uniform(
            kw, (fan_in, fan_out), jnp.float32, -bound, bound)
        params[f"b{idx}"] = jax.random.uniform(
            kb, (1, fan_out), jnp.float32, -bound, bound)
    return params


def forestdnn_reference_bf16(x, params):
    """Pure-JAX reference with the same bf16-input / f32-accumulate recipe."""
    h = jnp.dot(x.astype(jnp.bfloat16), params["w1"].astype(jnp.bfloat16),
                preferred_element_type=jnp.float32) + params["b1"]
    h = jnp.maximum(h, 0.0)
    h = jnp.dot(h.astype(jnp.bfloat16), params["w2"].astype(jnp.bfloat16),
                preferred_element_type=jnp.float32) + params["b2"]
    h = jnp.maximum(h, 0.0)
    h = jnp.dot(h.astype(jnp.bfloat16), params["w3"].astype(jnp.bfloat16),
                preferred_element_type=jnp.float32) + params["b3"]
    h = jnp.maximum(h, 0.0)
    return jnp.dot(h.astype(jnp.bfloat16), params["w4"].astype(jnp.bfloat16),
                   preferred_element_type=jnp.float32) + params["b4"]


def forestdnn_reference_f32(x, params):
    """Full-f32 reference (matches the PyTorch module in eval mode exactly)."""
    h = jnp.maximum(x @ params["w1"] + params["b1"], 0.0)
    h = jnp.maximum(h @ params["w2"] + params["b2"], 0.0)
    h = jnp.maximum(h @ params["w3"] + params["b3"], 0.0)
    return h @ params["w4"] + params["b4"]


if __name__ == "__main__":
    key = jax.random.PRNGKey(0)
    k_params, k_x, k_x2 = jax.random.split(key, 3)

    batch = 8
    input_features = 32   # e.g. one-hot-encoded random-forest leaf features

    params = init_params(k_params, input_features)
    x = jax.random.normal(k_x, (batch, input_features), jnp.float32)

    out = forestdnn_forward(x, params)
    out = jax.block_until_ready(out)
    assert out.shape == (batch, 2), out.shape

    ref_bf16 = forestdnn_reference_bf16(x, params)
    ref_f32 = forestdnn_reference_f32(x, params)
    err_bf16 = float(jnp.max(jnp.abs(out - ref_bf16)))
    err_f32 = float(jnp.max(jnp.abs(out - ref_f32)))
    assert jnp.allclose(out, ref_bf16, atol=2e-2, rtol=2e-2), \
        f"max abs err vs bf16 reference {err_bf16}"
    assert jnp.allclose(out, ref_f32, atol=1e-1, rtol=1e-1), \
        f"max abs err vs f32 reference {err_f32}"

    # Exercise the multi-step grid path (ragged batch -> padding, >1 block,
    # lane-dense (8, 128) transposed output blocks).
    batch2 = 300
    x2 = jax.random.normal(k_x2, (batch2, input_features), jnp.float32)
    out2 = jax.block_until_ready(forestdnn_forward(x2, params, batch_tile=128))
    ref2 = forestdnn_reference_bf16(x2, params)
    assert out2.shape == (batch2, 2), out2.shape
    assert jnp.allclose(out2, ref2, atol=2e-2, rtol=2e-2), \
        f"max abs err (multi-step) {float(jnp.max(jnp.abs(out2 - ref2)))}"

    print("KERNEL_OK")
</pallas_src>

<mosaic_0001>
module attributes {stable_mosaic.version = 11 : i64} {
  func.func @forestdnn_kernel(%arg0: i32, %arg1: memref<8x32xbf16, #tpu.memory_space<vmem>>, %arg2: memref<32x256xbf16, #tpu.memory_space<vmem>>, %arg3: memref<1x256xf32, #tpu.memory_space<vmem>>, %arg4: memref<256x128xbf16, #tpu.memory_space<vmem>>, %arg5: memref<1x128xf32, #tpu.memory_space<vmem>>, %arg6: memref<128x64xbf16, #tpu.memory_space<vmem>>, %arg7: memref<1x64xf32, #tpu.memory_space<vmem>>, %arg8: memref<8x64xbf16, #tpu.memory_space<vmem>>, %arg9: memref<8x1xf32, #tpu.memory_space<vmem>>, %arg10: memref<8x8xf32, #tpu.memory_space<vmem>>) attributes {dimension_semantics = [#tpu.dimension_semantics<parallel>], iteration_bounds = array<i64: 1>, scalar_prefetch = 0 : i64, scratch_operands = 0 : i64, tpu.core_type = #tpu.core_type<tc>, window_params = [{transform_indices = @transform_0, window_bounds = array<i64: 8, 32>}, {pipeline_mode = #tpu.pipeline_mode<synchronous>, transform_indices = @transform_1, window_bounds = array<i64: 32, 256>}, {pipeline_mode = #tpu.pipeline_mode<synchronous>, transform_indices = @transform_2, window_bounds = array<i64: 1, 256>}, {pipeline_mode = #tpu.pipeline_mode<synchronous>, transform_indices = @transform_3, window_bounds = array<i64: 256, 128>}, {pipeline_mode = #tpu.pipeline_mode<synchronous>, transform_indices = @transform_4, window_bounds = array<i64: 1, 128>}, {pipeline_mode = #tpu.pipeline_mode<synchronous>, transform_indices = @transform_5, window_bounds = array<i64: 128, 64>}, {pipeline_mode = #tpu.pipeline_mode<synchronous>, transform_indices = @transform_6, window_bounds = array<i64: 1, 64>}, {pipeline_mode = #tpu.pipeline_mode<synchronous>, transform_indices = @transform_7, window_bounds = array<i64: 8, 64>}, {pipeline_mode = #tpu.pipeline_mode<synchronous>, transform_indices = @transform_8, window_bounds = array<i64: 8, 1>}, {transform_indices = @transform_9, window_bounds = array<i64: 8, 8>}]} {
    %c0 = arith.constant 0 : index
    %c0_0 = arith.constant 0 : index
    %0 = vector.load %arg1[%c0, %c0_0] : memref<8x32xbf16, #tpu.memory_space<vmem>>, vector<8x32xbf16>
    %c0_1 = arith.constant 0 : index
    %c0_2 = arith.constant 0 : index
    %1 = vector.load %arg2[%c0_1, %c0_2] : memref<32x256xbf16, #tpu.memory_space<vmem>>, vector<32x256xbf16>
    %cst = arith.constant dense<0.000000e+00> : vector<8x256xf32>
    %2 = tpu.matmul %0, %1, %cst {dimension_numbers = #tpu.dot_dimension_numbers<[1], [0], [0], [1], [0, 0, 1, 1], [], []>} : vector<8x32xbf16>, vector<32x256xbf16>, vector<8x256xf32> -> vector<8x256xf32>
    %c0_3 = arith.constant 0 : index
    %c0_4 = arith.constant 0 : index
    %3 = vector.load %arg3[%c0_3, %c0_4] : memref<1x256xf32, #tpu.memory_space<vmem>>, vector<1x256xf32>
    %4 = vector.broadcast %3 : vector<1x256xf32> to vector<8x256xf32>
    %5 = arith.addf %2, %4 : vector<8x256xf32>
    %cst_5 = arith.constant 0.000000e+00 : f32
    %6 = vector.broadcast %cst_5 : f32 to vector<8x256xf32>
    %7 = arith.maximumf %5, %6 : vector<8x256xf32>
    %8 = arith.truncf %7 : vector<8x256xf32> to vector<8x256xbf16>
    %c0_6 = arith.constant 0 : index
    %c0_7 = arith.constant 0 : index
    %9 = vector.load %arg4[%c0_6, %c0_7] : memref<256x128xbf16, #tpu.memory_space<vmem>>, vector<256x128xbf16>
    %cst_8 = arith.constant dense<0.000000e+00> : vector<8x128xf32>
    %10 = tpu.matmul %8, %9, %cst_8 {dimension_numbers = #tpu.dot_dimension_numbers<[1], [0], [0], [1], [0, 0, 1, 1], [], []>} : vector<8x256xbf16>, vector<256x128xbf16>, vector<8x128xf32> -> vector<8x128xf32>
    %c0_9 = arith.constant 0 : index
    %c0_10 = arith.constant 0 : index
    %11 = vector.load %arg5[%c0_9, %c0_10] : memref<1x128xf32, #tpu.memory_space<vmem>>, vector<1x128xf32>
    %12 = vector.broadcast %11 : vector<1x128xf32> to vector<8x128xf32>
    %13 = arith.addf %10, %12 : vector<8x128xf32>
    %cst_11 = arith.constant 0.000000e+00 : f32
    %14 = vector.broadcast %cst_11 : f32 to vector<8x128xf32>
    %15 = arith.maximumf %13, %14 : vector<8x128xf32>
    %16 = arith.truncf %15 : vector<8x128xf32> to vector<8x128xbf16>
    %c0_12 = arith.constant 0 : index
    %c0_13 = arith.constant 0 : index
    %17 = vector.load %arg6[%c0_12, %c0_13] : memref<128x64xbf16, #tpu.memory_space<vmem>>, vector<128x64xbf16>
    %cst_14 = arith.constant dense<0.000000e+00> : vector<8x64xf32>
    %18 = tpu.matmul %16, %17, %cst_14 {dimension_numbers = #tpu.dot_dimension_numbers<[1], [0], [0], [1], [0, 0, 1, 1], [], []>} : vector<8x128xbf16>, vector<128x64xbf16>, vector<8x64xf32> -> vector<8x64xf32>
    %c0_15 = arith.constant 0 : index
    %c0_16 = arith.constant 0 : index
    %19 = vector.load %arg7[%c0_15, %c0_16] : memref<1x64xf32, #tpu.memory_space<vmem>>, vector<1x64xf32>
    %20 = vector.broadcast %19 : vector<1x64xf32> to vector<8x64xf32>
    %21 = arith.addf %18, %20 : vector<8x64xf32>
    %cst_17 = arith.constant 0.000000e+00 : f32
    %22 = vector.broadcast %cst_17 : f32 to vector<8x64xf32>
    %23 = arith.maximumf %21, %22 : vector<8x64xf32>
    %24 = tpu.transpose %23, [1, 0] : vector<8x64xf32> -> vector<64x8xf32>
    %25 = arith.truncf %24 : vector<64x8xf32> to vector<64x8xbf16>
    %c0_18 = arith.constant 0 : index
    %c0_19 = arith.constant 0 : index
    %26 = vector.load %arg8[%c0_18, %c0_19] : memref<8x64xbf16, #tpu.memory_space<vmem>>, vector<8x64xbf16>
    %cst_20 = arith.constant dense<0.000000e+00> : vector<8x8xf32>
    %27 = tpu.matmul %26, %25, %cst_20 {dimension_numbers = #tpu.dot_dimension_numbers<[1], [0], [0], [1], [0, 0, 1, 1], [], []>} : vector<8x64xbf16>, vector<64x8xbf16>, vector<8x8xf32> -> vector<8x8xf32>
    %c0_21 = arith.constant 0 : index
    %c0_22 = arith.constant 0 : index
    %28 = vector.load %arg9[%c0_21, %c0_22] : memref<8x1xf32, #tpu.memory_space<vmem>>, vector<8x1xf32>
    %29 = vector.broadcast %28 : vector<8x1xf32> to vector<8x8xf32>
    %30 = arith.addf %27, %29 : vector<8x8xf32>
    %c0_23 = arith.constant 0 : index
    %c0_24 = arith.constant 0 : index
    %31 = vector.load %arg10[%c0_23, %c0_24] : memref<8x8xf32, #tpu.memory_space<vmem>>, vector<8x8xf32>
    tpu.vector_store %arg10[%c0_23, %c0_24], %30 {strides = array<i32>} : memref<8x8xf32, #tpu.memory_space<vmem>>, vector<8x8xf32>,
    return
  }
  func.func @transform_0(%arg0: i32) -> (i32, i32) {
    %c0_i32 = arith.constant 0 : i32
    %c0_i32_0 = arith.constant 0 : i32
    return %arg0, %c0_i32 : i32, i32
  }
  func.func @transform_1(%arg0: i32) -> (i32, i32) {
    %c0_i32 = arith.constant 0 : i32
    %c0_i32_0 = arith.constant 0 : i32
    %c0_i32_1 = arith.constant 0 : i32
    return %c0_i32, %c0_i32_0 : i32, i32
  }
  func.func @transform_2(%arg0: i32) -> (i32, i32) {
    %c0_i32 = arith.constant 0 : i32
    %c0_i32_0 = arith.constant 0 : i32
    %c0_i32_1 = arith.constant 0 : i32
    return %c0_i32, %c0_i32_0 : i32, i32
  }
  func.func @transform_3(%arg0: i32) -> (i32, i32) {
    %c0_i32 = arith.constant 0 : i32
    %c0_i32_0 = arith.constant 0 : i32
    %c0_i32_1 = arith.constant 0 : i32
    return %c0_i32, %c0_i32_0 : i32, i32
  }
  func.func @transform_4(%arg0: i32) -> (i32, i32) {
    %c0_i32 = arith.constant 0 : i32
    %c0_i32_0 = arith.constant 0 : i32
    %c0_i32_1 = arith.constant 0 : i32
    return %c0_i32, %c0_i32_0 : i32, i32
  }
  func.func @transform_5(%arg0: i32) -> (i32, i32) {
    %c0_i32 = arith.constant 0 : i32
    %c0_i32_0 = arith.constant 0 : i32
    %c0_i32_1 = arith.constant 0 : i32
    return %c0_i32, %c0_i32_0 : i32, i32
  }
  func.func @transform_6(%arg0: i32) -> (i32, i32) {
    %c0_i32 = arith.constant 0 : i32
    %c0_i32_0 = arith.constant 0 : i32
    %c0_i32_1 = arith.constant 0 : i32
    return %c0_i32, %c0_i32_0 : i32, i32
  }
  func.func @transform_7(%arg0: i32) -> (i32, i32) {
    %c0_i32 = arith.constant 0 : i32
    %c0_i32_0 = arith.constant 0 : i32
    %c0_i32_1 = arith.constant 0 : i32
    return %c0_i32, %c0_i32_0 : i32, i32
  }
  func.func @transform_8(%arg0: i32) -> (i32, i32) {
    %c0_i32 = arith.constant 0 : i32
    %c0_i32_0 = arith.constant 0 : i32
    %c0_i32_1 = arith.constant 0 : i32
    return %c0_i32, %c0_i32_0 : i32, i32
  }
  func.func @transform_9(%arg0: i32) -> (i32, i32) {
    %c0_i32 = arith.constant 0 : i32
    %c0_i32_0 = arith.constant 0 : i32
    return %c0_i32, %arg0 : i32, i32
  }
}

</mosaic_0001>

<bundles_post_ra>
// kernel: tpu_custom_call.1
= control target key start
LH: loop header
LB: loop body
LE: loop exit
PB: predicated region body
PF: predicated region fallthrough
CT: control target
= control target key end

     0   :  { %14 = vsyncpa [#allocation3], 0  ;;  %s864_s0 = inlined_call_operand.vmem [shape: bf16[8,32], index: 0, kind: input, shape index: {}]   ;;  %s865_s1 = inlined_call_operand.vmem [shape: bf16[32,256], index: 1, kind: input, shape index: {}]   ;;  %s866_s2 = inlined_call_operand.vmem [shape: f32[1,256], index: 2, kind: input, shape index: {}]   ;;  %s867_s3 = inlined_call_operand.hbm [shape: bf16[256,128], index: 3, kind: input, shape index: {}]   ;;  %s868_s4 = inlined_call_operand.vmem [shape: f32[1,128], index: 4, kind: input, shape index: {}]   ;;  %s869_s5 = inlined_call_operand.vmem [shape: bf16[128,64], index: 5, kind: input, shape index: {}]   ;;  %s870_s6 = inlined_call_operand.vmem [shape: f32[1,64], index: 6, kind: input, shape index: {}]   ;;  %s871_s7 = inlined_call_operand.vmem [shape: bf16[8,64], index: 7, kind: input, shape index: {}]   ;;  %s872_s8 = inlined_call_operand.vmem [shape: f32[8,1], index: 8, kind: input, shape index: {}]   ;;  %s873_s9 = inlined_call_operand.hbm [shape: f32[8,8], index: 9, kind: output, shape index: {}]  }
   0x1   :  { %15 = vsyncpa [#allocation4], 0  ;;  %s713_s30 = smov [#allocation2]   ;;  %s665_s13 = scalar_lea.hbm %s867_s3, 2048 }
   0x2   :  { %s27_s10 = sshll.u32 %s713_s30, 4  ;;  %p666_p0 = scmp.ne.s32.totalorder %s867_s3, %s665_s13  ;;  %s28_s10 = int_to_ptr.vmem [resolvable:$true] %s27_s10 }
   0x3   :  { %p669_p1 = scmp.lt.u32.totalorder %s665_s13, %s867_s3 }
   0x5   :  { %p671_p2 = pnand %p669_p1, %p666_p0 }
   0x7   :  { %674 = shalt.err (!%p671_p2)
}
   0x8   :  { %s675_s18 = scalar_lea.vmem %s28_s10, 2048  ;;  %p680_p4 = scmp.lt.s32.totalorder %s28_s10, %s28_s10 }
   0x9   :  { %p676_p3 = scmp.ne.s32.totalorder %s28_s10, %s675_s18  ;;  %p681_p5 = scmp.lt.s32.totalorder %s675_s18, %s675_s18 }
   0xb   :  { %p682_p6 = por %p681_p5, %p680_p4 }
   0xd   :  { %p683_p7 = pnand %p682_p6, %p676_p3 }
   0xf   :  { %686 = shalt.err (!%p683_p7)
}
  0x10   :  { %s714_s19 = smov 64   ;;  %s715_s20 = smov 4  }
  0x11   :  { %33 = dma.hbm_to_vmem [thread:$0]  %s867_s3, 2048, %s28_s10, [#allocation3], %s714_s19, %s714_s19, %s715_s20  }
  0x12   :  { %709 = dma.done.wait [#allocation3], 2048  }
  0x13   :  { %710 = vsyncadd [#allocation3], 4294965248  ;;  %v716_v0 = vmov 0   ;;  %v635_v1 = vld [vmem:[%s865_s1 + $0x4] ss:$8 sps:$4 sm:$0xff]   ;;  %vm85_vm0 = vcmask 261120   ;;  %v55_v29 = vlaneseq }
  0x14   :  { %121 = vmatprep.mubr.bf16.mxu0 %v716_v0  ;;  %v637_v2 = vld [vmem:[%s865_s1] ss:$8 sps:$4 sm:$0xff]   ;;  %89 = vmatprep.subr.bf16.mxu0 %v635_v1  ;;  %v638_v3 = vld [vmem:[%s865_s1 + $0x14] ss:$8 sps:$4 sm:$0xff]   ;;  %v640_v4 = vld [vmem:[%s865_s1 + $0x10] ss:$8 sps:$4 sm:$0xff]  }
  0x15   :  { %90 = vmatpush1.bf16.msra.mxu0 %v637_v2  ;;  %v641_v5 = vld [vmem:[#allocation2 + $0x40] sm:$0xff]   ;;  %v643_v8 = vld [vmem:[#allocation2 + $0x48] sm:$0xff]   ;;  %v645_v10 = vld [vmem:[#allocation2 + $0x50] sm:$0xff]   ;;  %v717_v23 = vmov 0.0   ;;  %v56_v30 = vshrl.u32 %v55_v29, 7  ;;  %vm718_vm1 = vmmov 0  }
  0x16   :  { %91 = vmatprep.subr.bf16.mxu0 %v638_v3  ;;  %v642_v6 = vld [vmem:[#allocation2] sm:$0xff]   ;;  %559 = vmatprep.subr.bf16.mxu1 %v641_v5  ;;  %v644_v9 = vld [vmem:[#allocation2 + $0x8] sm:$0xff]   ;;  %v646_v11 = vld [vmem:[#allocation2 + $0x10] sm:$0xff]   ;;  %vm466_vm2 = vcmask 523264   ;;  %s719_s3 = smov [#allocation5]   ;;  %vm510_vm3 = vcmask 64512  }
  0x17   :  { %v48_v7 = vld [vmem:[%s864_s0] sm:$0xf]  ;;  %560 = vmatpush3.bf16.msra.mxu1 %v642_v6  ;;  %v647_v12 = vld [vmem:[#allocation2 + $0x58] sm:$0xff]   ;;  %v651_v16 = vld [vmem:[#allocation2 + $0x68] sm:$0xff]   ;;  %v57_v31 = vsub.s32 0, %v56_v30  ;;  %v61_v33 = vsub.s32 1, %v56_v30 }
  0x18   :  { %561 = vmatprep.subr.bf16.mxu1 %v643_v8  ;;  %v648_v13 = vld [vmem:[#allocation2 + $0x18] sm:$0xff]   ;;  %v649_v14 = vld [vmem:[#allocation2 + $0x60] sm:$0xff]   ;;  %v652_v17 = vld [vmem:[#allocation2 + $0x28] sm:$0xff]   ;;  %s518_s30 = sshll.u32 %s719_s3, 4  ;;  %s519_s30 = int_to_ptr.vmem [resolvable:$true] %s518_s30 }
  0x19   :  { %92 = vmatpush1.bf16.msra.mxu0 %v640_v4  ;;  %v650_v15 = vld [vmem:[#allocation2 + $0x20] sm:$0xff]   ;;  %v653_v18 = vld [vmem:[#allocation2 + $0x70] sm:$0xff]   ;;  %v655_v20 = vld [vmem:[#allocation2 + $0x78] sm:$0xff]   ;;  %s687_s10 = scalar_lea.vmem %s519_s30, 128  ;;  %p692_p9 = scmp.lt.s32.totalorder %s519_s30, %s519_s30 }
  0x1a   :  { %v654_v19 = vld [vmem:[#allocation2 + $0x30] sm:$0xff]   ;;  %v656_v21 = vld [vmem:[#allocation2 + $0x38] sm:$0xff]   ;;  %v657_v22 = vld [vmem:[%s869_s5] sm:$0xff]   ;;  %595 = vmatprep.subr.bf16.mxu0 %v717_v23  ;;  %p688_p8 = scmp.ne.s32.totalorder %s519_s30, %s687_s10  ;;  %p693_p10 = scmp.lt.s32.totalorder %s687_s10, %s687_s10 }
  0x1b   :  { %562 = vmatpush3.bf16.msra.mxu1 %v644_v9  ;;  %v658_v24 = vld [vmem:[%s869_s5 + $0x8] sm:$0xff]   ;;  %v659_v25 = vld [vmem:[%s869_s5 + $0x10] sm:$0xff]   ;;  %v660_v26 = vld [vmem:[%s869_s5 + $0x18] sm:$0xff]  }
  0x1c   :  { %531 = vmatmul.mubr.msk.bf16.vlgmr.msra.gmra.mrb[0].mxu0 %vm85_vm0, %v48_v7  ;;  %563 = vmatprep.subr.bf16.mxu1 %v645_v10  ;;  %v661_v27 = vld [vmem:[%s869_s5 + $0x20] sm:$0xff]   ;;  %v662_v28 = vld [vmem:[%s869_s5 + $0x28] sm:$0xff]   ;;  %v663_v46 = vld [vmem:[%s869_s5 + $0x30] sm:$0xff]   ;;  %p694_p11 = por %p693_p10, %p692_p9 }
  0x1d   :  { %596 = vmatpush3.bf16.msra.mxu0 %v657_v22  ;;  %v53_v32 = vld [vmem:[%s866_s2] sm:$0x3]  ;;  %v664_v47 = vld [vmem:[%s869_s5 + $0x38] sm:$0xff]   ;;  %611 = vmatprep.mubr.msk.bf16.mxu0 %vm718_vm1, %v717_v23 }
  0x1e   :  { %597 = vmatprep.subr.bf16.mxu0 %v717_v23  ;;  %v58_v34 = vrot.slane %v53_v32, %v57_v31  ;;  %v62_v35 = vrot.slane %v53_v32, %v61_v33  ;;  %v532_v49 = vld [vmem:[%s868_s4] ss:$0 sm:$0xff]  ;;  %p695_p12 = pnand %p694_p11, %p688_p8 }
  0x1f   :  { %564 = vmatpush3.bf16.msra.mxu1 %v646_v11  ;;  %v549_v57 = vld [vmem:[%s870_s6] ss:$0 sm:$0xff] }
  0x20   :  { %565 = vmatprep.subr.bf16.mxu1 %v647_v12  ;;  %v460_v1 = vld [vmem:[%s872_s8] sm:$0xff] }
  0x21   :  { %598 = vmatpush3.bf16.msra.mxu0 %v658_v24 }
  0x22   :  { %599 = vmatprep.subr.bf16.mxu0 %v717_v23 }
  0x23   :  { %566 = vmatpush3.bf16.msra.mxu1 %v648_v13  ;;  %v459_v13 = vld [vmem:[%s871_s7] sm:$0xf] }
  0x24   :  { %567 = vmatprep.subr.bf16.mxu1 %v649_v14 }
  0x25   :  { %600 = vmatpush3.bf16.msra.mxu0 %v659_v25 }
  0x26   :  { %601 = vmatprep.subr.bf16.mxu0 %v717_v23 }
  0x27   :  { %568 = vmatpush3.bf16.msra.mxu1 %v650_v15 }
  0x28   :  { %569 = vmatprep.subr.bf16.mxu1 %v651_v16 }
  0x29   :  { %602 = vmatpush3.bf16.msra.mxu0 %v660_v26 }
  0x2a   :  { %603 = vmatprep.subr.bf16.mxu0 %v717_v23 }
  0x2b   :  { %570 = vmatpush3.bf16.msra.mxu1 %v652_v17 }
  0x2c   :  { %571 = vmatprep.subr.bf16.mxu1 %v653_v18 }
  0x2d   :  { %604 = vmatpush3.bf16.msra.mxu0 %v661_v27 }
  0x2e   :  { %605 = vmatprep.subr.bf16.mxu0 %v717_v23 }
  0x2f   :  { %572 = vmatpush3.bf16.msra.mxu1 %v654_v19 }
  0x30   :  { %573 = vmatprep.subr.bf16.mxu1 %v655_v20 }
  0x31   :  { %606 = vmatpush3.bf16.msra.mxu0 %v662_v28 }
  0x32   :  { %607 = vmatprep.subr.bf16.mxu0 %v717_v23 }
  0x33   :  { %574 = vmatpush3.bf16.msra.mxu1 %v656_v21 }
  0x34   :  { %615 = vmatprep.subr.bf16.mxu1 %v717_v23 }
  0x35   :  { %608 = vmatpush3.bf16.msra.mxu0 %v663_v46 }
  0x36   :  { %609 = vmatprep.subr.bf16.mxu0 %v717_v23 }
  0x39   :  { %610 = vmatpush3.bf16.msra.mxu0 %v664_v47 }
  0xef   :  { %v123_v36 = vpop.f32.mrb[0].mxu0 }
  0xf0   :  { %v124_v37 = vadd.f32 %v123_v36, %v58_v34  ;;  %v125_v38 = vpop.f32.mrb[1].mxu0 }
  0xf1   :  { %v126_v39 = vadd.f32 %v125_v38, %v62_v35  ;;  %v127_v40 = vpop.f32.mrb[2].mxu0 }
  0xf2   :  { %v130_v41 = vmax.f32 %v124_v37, 0.0  ;;  %v128_v42 = vpop.f32.mrb[3].mxu0 }
  0xf3   :  { %v131_v43 = vmax.f32 %v126_v39, 0.0 }
  0xf4   :  { %v132_v45 = vpack.c.bf16 %v130_v41, %v130_v41 }
  0xf5   :  { %v133_v44 = vpack.c.bf16 %v131_v43, %v131_v43 }
  0xf7   :  { %301 = vmatprep.mubr.bf16.mxu1 %v133_v44 }
  0xf8   :  { %302 = vmatmul.mubr.bf16.vlgmr.msra.gmra.mrb[0].mxu1 %v132_v45 }
  0xf9   :  { %623 = vmatprep.mubr.msk.bf16.mxu1 %vm718_vm1, %v717_v23 }
 0x1cb   :  { %v575_v48 = vpop.f32.mrb[0].mxu1 }
 0x1cc   :  { %v576_v50 = vpop.f32.mrb[1].mxu1 }
 0x1cd   :  { %v577_v51 = vadd.f32 %v576_v50, %v575_v48  ;;  %v578_v52 = vpop.f32.mrb[2].mxu1 }
 0x1ce   :  { %v579_v53 = vpop.f32.mrb[3].mxu1 }
 0x1cf   :  { %v304_v54 = vadd.f32 %v577_v51, %v532_v49 }
 0x1d1   :  { %v309_v55 = vmax.f32 %v304_v54, 0.0 }
 0x1d3   :  { %v310_v56 = vpack.c.bf16 %v309_v55, %v309_v55 }
 0x1d5   :  { %612 = vmatmul.mubr.bf16.vlgmr.msra.gmra.mrb[4].mxu0 %v310_v56 }
 0x2a8   :  { %v416_v58 = vpop.f32.mrb[4].mxu0 }
 0x2a9   :  { %v613_v59 = vpop.f32.mrb[5].mxu0  ;;  %v417_v60 = vadd.f32 %v549_v57, %v416_v58 }
 0x2aa   :  { %v419_v61 = vpop.f32.mrb[6].mxu0 }
 0x2ab   :  { %v614_v62 = vpop.f32.mrb[7].mxu0  ;;  %v422_v63 = vmax.f32 %v417_v60, 0.0 }
 0x2ad   :  { %423 = vxpose.xlu0.b32.start.end [1/1] (short) (narrow) %v422_v63, 64 }
 0x2d6   :  { %634 = vset.pattern.permute.xlu0 %v716_v0 }
 0x2f2   :  { %463 = vperm.xlu0 %634, %v460_v1  }
 0x32d   :  { %v439_v2 = vpop.trf.xlu0 }
 0x331   :  { %v440_v3 = vpop.trf.xlu0 }
 0x332   :  { %v455_v4 = vpack.c.bf16 %v440_v3, %v439_v2 }
 0x334   :  { %616 = vmatpush3.bf16.msra.mxu1 %v455_v4 }
 0x335   :  { %v441_v5 = vpop.trf.xlu0  ;;  %617 = vmatprep.subr.bf16.mxu1 %v717_v23 }
 0x339   :  { %v442_v6 = vpop.trf.xlu0 }
 0x33a   :  { %v456_v7 = vpack.c.bf16 %v442_v6, %v441_v5 }
 0x33c   :  { %618 = vmatpush3.bf16.msra.mxu1 %v456_v7 }
 0x33d   :  { %v443_v8 = vpop.trf.xlu0  ;;  %619 = vmatprep.subr.bf16.mxu1 %v717_v23 }
 0x341   :  { %v444_v9 = vpop.trf.xlu0 }
 0x342   :  { %v457_v0 = vpack.c.bf16 %v444_v9, %v443_v8 }
 0x344   :  { %620 = vmatpush3.bf16.msra.mxu1 %v457_v0 }
 0x345   :  { %v445_v10 = vpop.trf.xlu0  ;;  %621 = vmatprep.subr.bf16.mxu1 %v717_v23 }
 0x349   :  { %v446_v11 = vpop.trf.xlu0 }
 0x34a   :  { %v458_v12 = vpack.c.bf16 %v446_v11, %v445_v10 }
 0x34c   :  { %622 = vmatpush3.bf16.msra.mxu1 %v458_v12 }
 0x34f   :  { %624 = vmatmul.mubr.msk.bf16.vlgmr.msra.gmra.mrb[4].mxu1 %vm466_vm2, %v459_v13 }
 0x371   :  { %v464_v14 = vpop.permute.xlu0 %463 }
 0x422   :  { %v504_v15 = vpop.f32.mrb[4].mxu1 }
 0x423   :  { %v505_v16 = vadd.f32 %v504_v15, %v464_v14  ;;  %v625_v17 = vpop.f32.mrb[5].mxu1 }
 0x424   :  { %v507_v18 = vpop.f32.mrb[6].mxu1 }
 0x425   :  { %v626_v19 = vpop.f32.mrb[7].mxu1  ;;  %511 = vst.msk [vmem:[#allocation5] sm:$0xff] %vm510_vm3, %v505_v16 }
 0x426   :  { %698 = shalt.err (!%p695_p12)
}
 0x427   :  { %s699_s1 = scalar_lea.hbm %s873_s9, 128 }
 0x428   :  { %p700_p13 = scmp.ne.s32.totalorder %s873_s9, %s699_s1  ;;  %p703_p0 = scmp.lt.u32.totalorder %s699_s1, %s873_s9 }
 0x42a   :  { %p705_p1 = pnand %p703_p0, %p700_p13 }
 0x42c   :  { %708 = shalt.err (!%p705_p1)
}
 0x42d   :  { %521 = dma.vmem_to_hbm [thread:$0]  %s519_s30, 128, %s873_s9, [#allocation4]  }
 0x42e   :  { %711 = dma.done.wait [#allocation4], 128  }
 0x42f   :  { %712 = vsyncadd [#allocation4], 4294967168 }
 0x430   :  { %525 = vsyncpa [#allocation3], 1 }
 0x431   :  { %526 = vsyncpa [#allocation4], 1 }

</bundles_post_ra>
